<compile_context>
chip_gen: v5e
topology: v5e:2x2
jax: 0.10.0
libtpu: 0.0.40
codegen_flags: <defaults>
</compile_context>

<pallas_src>
import jax
import jax.numpy as jnp
import numpy as np
from jax.experimental import pallas as pl
from jax.experimental.pallas import tpu as pltpu


WS_EPS = 1e-4   # WSConv1d.forward default eps
BN_EPS = 1e-5   # nn.BatchNorm1d default eps


def _make_kernel(C_in, L, C_out, K, P, stride, L_out, activation):
    n_red = C_in * K                       # elements reduced per out-channel
    fan_in = float(C_out * C_in * K)       # torch.prod(torch.tensor(weight.shape))
    inv_n = 1.0 / n_red
    inv_nm1 = (1.0 / (n_red - 1)) if n_red > 1 else 0.0  # guard C_in*K == 1
    span = stride * (L_out - 1) + 1
    L_pad = L + 2 * P

    def kernel(x_ref, w_ref, pc_ref, out_ref, xs_ref):
        # ---- place this batch sample into the padded VMEM scratch ----------
        # Border columns re-zeroed every step: cheap (P columns) and correct
        # even when the batch grid axis is split across TensorCores.
        if P > 0:
            zpad = jnp.zeros((C_in, P), jnp.float32)
            xs_ref[:, 0:P] = zpad
            xs_ref[:, P + L:L_pad] = zpad
        xs_ref[:, P:P + L] = x_ref[0]                       # (C_in, L)

        # ---- weight standardization, BN scale folded into the gain ---------
        w = w_ref[...]                                      # (C_out, K*C_in)
        gain_eff = pc_ref[:, 0:1]                           # (C_out, 1) = gain*alpha
        beta = pc_ref[:, 1:2]                               # (C_out, 1)
        mean = jnp.sum(w, axis=1, keepdims=True) * inv_n
        d = w - mean
        var = jnp.sum(d * d, axis=1, keepdims=True) * inv_nm1   # unbiased, like torch
        scale = jax.lax.rsqrt(jnp.maximum(var * fan_in, WS_EPS)) * gain_eff
        w_fused = d * scale              # == (w*scale - mean*scale) * bn_alpha

        # ---- im2col windows read at the Ref level; one K*C_in contraction --
        windows = []
        for k in range(K):                                  # K is static & tiny
            win = xs_ref[:, k:k + span]                     # (C_in, span)
            if stride > 1:
                win = win[:, ::stride]                      # (C_in, L_out)
            windows.append(win)
        xcol = windows[0] if K == 1 else jnp.concatenate(windows, axis=0)

        y = jnp.dot(w_fused, xcol, preferred_element_type=jnp.float32)
        y = y + beta                                        # conv bias + BN folded
        if activation:
            y = jnp.maximum(y, 0.0)
        out_ref[0] = y                                      # (C_out, L_out), lane dim = L

    return kernel


def temporal_conv(x, params, *, stride=1, activation=False):
    """x: (N, C_in, L) f32  ->  (N, C_out, L_out) f32 (native PyTorch layout)."""
    N, C_in, L = x.shape
    C_out, C_in_w, K = params["weight"].shape
    assert C_in_w == C_in
    P = (K - 1) // 2
    L_out = (L + 2 * P - K) // stride + 1

    f32 = lambda v: jnp.asarray(v, jnp.float32)
    # Tiny per-channel pre-folds (C_out-sized vectors, negligible XLA cost):
    #   alpha    = bn_gamma / sqrt(bn_var + eps)
    #   beta     = (conv_bias - bn_mean) * alpha + bn_beta
    #   gain_eff = gain * alpha     (BN scale folded into the WS gain)
    alpha = f32(params["bn_gamma"]) * jax.lax.rsqrt(f32(params["bn_var"]) + BN_EPS)
    beta = (f32(params["bias"]) - f32(params["bn_mean"])) * alpha + f32(params["bn_beta"])
    gain_eff = f32(params["gain"]) * alpha
    pc = jnp.stack([gain_eff, beta], axis=1)                      # (C_out, 2)

    # weight flattened so column index = k*C_in + c_in  (matches im2col rows)
    w_flat = jnp.transpose(f32(params["weight"]), (0, 2, 1)).reshape(C_out, K * C_in)

    # (8,128)-padded VMEM budget for one grid step (inputs/outputs double-buffered).
    pad2 = lambda r, c: ((r + 7) // 8 * 8) * ((c + 127) // 128 * 128) * 4
    vmem_bytes = (2 * (pad2(C_in, L) + pad2(C_out, L_out))        # x, y tiles (2 bufs)
                  + pad2(C_out, K * C_in) + pad2(C_out, 2)        # resident constants
                  + pad2(C_in, L + 2 * P))                        # halo scratch
    assert vmem_bytes < 12 * 1024 * 1024, (
        f"per-step VMEM footprint {vmem_bytes} B too large; tile the L axis")

    kernel = _make_kernel(C_in, L, C_out, K, P, stride, L_out, activation)
    return pl.pallas_call(
        kernel,
        out_shape=jax.ShapeDtypeStruct((N, C_out, L_out), jnp.float32),
        grid=(N,),
        in_specs=[
            pl.BlockSpec((1, C_in, L), lambda n: (n, 0, 0)),       # per-batch x tile
            pl.BlockSpec((C_out, K * C_in), lambda n: (0, 0)),     # resident weight
            pl.BlockSpec((C_out, 2), lambda n: (0, 0)),            # resident (gain*alpha, beta)
        ],
        out_specs=pl.BlockSpec((1, C_out, L_out), lambda n: (n, 0, 0)),
        scratch_shapes=[pltpu.VMEM((C_in, L + 2 * P), jnp.float32)],
        compiler_params=pltpu.CompilerParams(
            dimension_semantics=("parallel",)),
    )(x.astype(jnp.float32), w_flat, pc)


def reference(x, params, *, stride=1, activation=False):
    """Plain-JAX reference of TemporalConv (eval mode) for self-check."""
    w = params["weight"]                                           # (C_out, C_in, K)
    _, _, K = w.shape
    P = (K - 1) // 2
    mean = jnp.mean(w, axis=(1, 2), keepdims=True)
    var = jnp.var(w, axis=(1, 2), keepdims=True, ddof=1)           # unbiased, like torch
    fan_in = float(w.size)
    scale = (jax.lax.rsqrt(jnp.maximum(var * fan_in, WS_EPS))
             * params["gain"].reshape(-1, 1, 1))
    w_std = w * scale - mean * scale
    y = jax.lax.conv_general_dilated(
        x, w_std, window_strides=(stride,), padding=[(P, P)],
        dimension_numbers=("NCH", "OIH", "NCH"),
        precision=jax.lax.Precision.HIGHEST)
    cvec = lambda v: v.reshape(1, -1, 1)
    y = y + cvec(params["bias"])
    y = ((y - cvec(params["bn_mean"]))
         * jax.lax.rsqrt(cvec(params["bn_var"]) + BN_EPS)
         * cvec(params["bn_gamma"]) + cvec(params["bn_beta"]))
    return jnp.maximum(y, 0.0) if activation else y


if __name__ == "__main__":
    # Small shapes consistent with the module's forward: batch=2, in_channels=4,
    # length=16, out_channels=32, kernel_size=3, stride=1, activation=True.
    N, C_IN, L = 2, 4, 16
    C_OUT, K, STRIDE = 32, 3, 1
    ACTIVATION = True

    key = jax.random.PRNGKey(0)
    ks = jax.random.split(key, 8)
    x = jax.random.normal(ks[0], (N, C_IN, L), dtype=jnp.float32)
    params = {
        "weight":   jax.random.normal(ks[1], (C_OUT, C_IN, K), jnp.float32),
        "gain":     1.0 + 0.1 * jax.random.normal(ks[2], (C_OUT,), jnp.float32),
        "bias":     0.1 * jax.random.normal(ks[3], (C_OUT,), jnp.float32),
        "bn_gamma": 1.0 + 0.1 * jax.random.normal(ks[4], (C_OUT,), jnp.float32),
        "bn_beta":  0.1 * jax.random.normal(ks[5], (C_OUT,), jnp.float32),
        "bn_mean":  0.1 * jax.random.normal(ks[6], (C_OUT,), jnp.float32),
        "bn_var":   0.5 + jax.random.uniform(ks[7], (C_OUT,), jnp.float32),
    }

    out = jax.block_until_ready(
        temporal_conv(x, params, stride=STRIDE, activation=ACTIVATION))
    ref = jax.block_until_ready(
        reference(x, params, stride=STRIDE, activation=ACTIVATION))
    np.testing.assert_allclose(np.asarray(out), np.asarray(ref),
                               rtol=2e-3, atol=2e-3)
    print("KERNEL_OK")
</pallas_src>

<mosaic_0001>
module attributes {stable_mosaic.version = 11 : i64} {
  func.func @kernel(%arg0: i32, %arg1: memref<1x4x16xf32, #tpu.memory_space<vmem>>, %arg2: memref<32x12xf32, #tpu.memory_space<vmem>>, %arg3: memref<32x2xf32, #tpu.memory_space<vmem>>, %arg4: memref<1x32x16xf32, #tpu.memory_space<vmem>>, %arg5: memref<4x18xf32, #tpu.memory_space<vmem>>) attributes {dimension_semantics = [#tpu.dimension_semantics<parallel>], iteration_bounds = array<i64: 2>, scalar_prefetch = 0 : i64, scratch_operands = 1 : i64, tpu.core_type = #tpu.core_type<tc>, window_params = [{transform_indices = @transform_0, window_bounds = array<i64: 1, 4, 16>}, {pipeline_mode = #tpu.pipeline_mode<synchronous>, transform_indices = @transform_1, window_bounds = array<i64: 32, 12>}, {pipeline_mode = #tpu.pipeline_mode<synchronous>, transform_indices = @transform_2, window_bounds = array<i64: 32, 2>}, {transform_indices = @transform_3, window_bounds = array<i64: 1, 32, 16>}]} {
    %cst = arith.constant 0.000000e+00 : f32
    %0 = vector.broadcast %cst : f32 to vector<4x1xf32>
    %c0 = arith.constant 0 : index
    %c0_0 = arith.constant 0 : index
    %1 = vector.load %arg5[%c0, %c0_0] : memref<4x18xf32, #tpu.memory_space<vmem>>, vector<4x1xf32>
    tpu.vector_store %arg5[%c0, %c0_0], %0 {strides = array<i32>} : memref<4x18xf32, #tpu.memory_space<vmem>>, vector<4x1xf32>,
    %c0_1 = arith.constant 0 : index
    %c17 = arith.constant 17 : index
    %2 = vector.load %arg5[%c0_1, %c17] : memref<4x18xf32, #tpu.memory_space<vmem>>, vector<4x1xf32>
    tpu.vector_store %arg5[%c0_1, %c17], %0 {strides = array<i32>} : memref<4x18xf32, #tpu.memory_space<vmem>>, vector<4x1xf32>,
    %c0_2 = arith.constant 0 : index
    %c0_3 = arith.constant 0 : index
    %c0_4 = arith.constant 0 : index
    %3 = vector.load %arg1[%c0_2, %c0_3, %c0_4] : memref<1x4x16xf32, #tpu.memory_space<vmem>>, vector<1x4x16xf32>
    %4 = vector.shape_cast %3 : vector<1x4x16xf32> to vector<4x16xf32>
    %c0_5 = arith.constant 0 : index
    %c1 = arith.constant 1 : index
    %5 = vector.load %arg5[%c0_5, %c1] : memref<4x18xf32, #tpu.memory_space<vmem>>, vector<4x16xf32>
    tpu.vector_store %arg5[%c0_5, %c1], %4 {strides = array<i32>} : memref<4x18xf32, #tpu.memory_space<vmem>>, vector<4x16xf32>,
    %c0_6 = arith.constant 0 : index
    %c0_7 = arith.constant 0 : index
    %6 = vector.load %arg2[%c0_6, %c0_7] : memref<32x12xf32, #tpu.memory_space<vmem>>, vector<32x12xf32>
    %c0_8 = arith.constant 0 : index
    %c0_9 = arith.constant 0 : index
    %7 = vector.load %arg3[%c0_8, %c0_9] : memref<32x2xf32, #tpu.memory_space<vmem>>, vector<32x1xf32>
    %c0_10 = arith.constant 0 : index
    %c1_11 = arith.constant 1 : index
    %8 = vector.load %arg3[%c0_10, %c1_11] : memref<32x2xf32, #tpu.memory_space<vmem>>, vector<32x1xf32>
    %cst_12 = arith.constant dense<0.000000e+00> : vector<32xf32>
    %9 = vector.multi_reduction <add>, %6, %cst_12 [1] : vector<32x12xf32> to vector<32xf32>
    %10 = vector.shape_cast %9 : vector<32xf32> to vector<32x1xf32>
    %cst_13 = arith.constant 0.0833333358 : f32
    %11 = vector.broadcast %cst_13 : f32 to vector<32x1xf32>
    %12 = arith.mulf %10, %11 : vector<32x1xf32>
    %13 = vector.broadcast %12 : vector<32x1xf32> to vector<32x12xf32>
    %14 = arith.subf %6, %13 : vector<32x12xf32>
    %15 = arith.mulf %14, %14 : vector<32x12xf32>
    %cst_14 = arith.constant dense<0.000000e+00> : vector<32xf32>
    %16 = vector.multi_reduction <add>, %15, %cst_14 [1] : vector<32x12xf32> to vector<32xf32>
    %17 = vector.shape_cast %16 : vector<32xf32> to vector<32x1xf32>
    %cst_15 = arith.constant 0.0909090936 : f32
    %18 = vector.broadcast %cst_15 : f32 to vector<32x1xf32>
    %19 = arith.mulf %17, %18 : vector<32x1xf32>
    %cst_16 = arith.constant 3.840000e+02 : f32
    %20 = vector.broadcast %cst_16 : f32 to vector<32x1xf32>
    %21 = arith.mulf %19, %20 : vector<32x1xf32>
    %cst_17 = arith.constant 9.99999974E-5 : f32
    %22 = vector.broadcast %cst_17 : f32 to vector<32x1xf32>
    %23 = arith.maximumf %21, %22 : vector<32x1xf32>
    %24 = math.rsqrt %23 : vector<32x1xf32>
    %25 = arith.mulf %24, %7 : vector<32x1xf32>
    %26 = vector.broadcast %25 : vector<32x1xf32> to vector<32x12xf32>
    %27 = arith.mulf %14, %26 : vector<32x12xf32>
    %c0_18 = arith.constant 0 : index
    %c0_19 = arith.constant 0 : index
    %28 = vector.load %arg5[%c0_18, %c0_19] : memref<4x18xf32, #tpu.memory_space<vmem>>, vector<4x16xf32>
    %c0_20 = arith.constant 0 : index
    %c1_21 = arith.constant 1 : index
    %29 = vector.load %arg5[%c0_20, %c1_21] : memref<4x18xf32, #tpu.memory_space<vmem>>, vector<4x16xf32>
    %c0_22 = arith.constant 0 : index
    %c2 = arith.constant 2 : index
    %30 = vector.load %arg5[%c0_22, %c2] : memref<4x18xf32, #tpu.memory_space<vmem>>, vector<4x16xf32>
    %31 = tpu.concatenate %28, %29, %30 in 0 : vector<4x16xf32>, vector<4x16xf32>, vector<4x16xf32> -> vector<12x16xf32>
    %cst_23 = arith.constant dense<0.000000e+00> : vector<32x16xf32>
    %32 = tpu.matmul %27, %31, %cst_23 {dimension_numbers = #tpu.dot_dimension_numbers<[1], [0], [0], [1], [0, 0, 1, 1], [], []>} : vector<32x12xf32>, vector<12x16xf32>, vector<32x16xf32> -> vector<32x16xf32>
    %33 = vector.broadcast %8 : vector<32x1xf32> to vector<32x16xf32>
    %34 = arith.addf %32, %33 : vector<32x16xf32>
    %cst_24 = arith.constant 0.000000e+00 : f32
    %35 = vector.broadcast %cst_24 : f32 to vector<32x16xf32>
    %36 = arith.maximumf %34, %35 : vector<32x16xf32>
    %c0_25 = arith.constant 0 : index
    %c0_26 = arith.constant 0 : index
    %c0_27 = arith.constant 0 : index
    %37 = vector.load %arg4[%c0_25, %c0_26, %c0_27] : memref<1x32x16xf32, #tpu.memory_space<vmem>>, vector<1x32x16xf32>
    %38 = vector.shape_cast %37 : vector<1x32x16xf32> to vector<32x16xf32>
    %39 = vector.shape_cast %36 : vector<32x16xf32> to vector<1x32x16xf32>
    tpu.vector_store %arg4[%c0_25, %c0_26, %c0_27], %39 {strides = array<i32>} : memref<1x32x16xf32, #tpu.memory_space<vmem>>, vector<1x32x16xf32>,
    return
  }
  func.func @transform_0(%arg0: i32) -> (i32, i32, i32) {
    %c0_i32 = arith.constant 0 : i32
    %c0_i32_0 = arith.constant 0 : i32
    %c0_i32_1 = arith.constant 0 : i32
    return %arg0, %c0_i32, %c0_i32_0 : i32, i32, i32
  }
  func.func @transform_1(%arg0: i32) -> (i32, i32) {
    %c0_i32 = arith.constant 0 : i32
    %c0_i32_0 = arith.constant 0 : i32
    %c0_i32_1 = arith.constant 0 : i32
    return %c0_i32, %c0_i32_0 : i32, i32
  }
  func.func @transform_2(%arg0: i32) -> (i32, i32) {
    %c0_i32 = arith.constant 0 : i32
    %c0_i32_0 = arith.constant 0 : i32
    %c0_i32_1 = arith.constant 0 : i32
    return %c0_i32, %c0_i32_0 : i32, i32
  }
  func.func @transform_3(%arg0: i32) -> (i32, i32, i32) {
    %c0_i32 = arith.constant 0 : i32
    %c0_i32_0 = arith.constant 0 : i32
    %c0_i32_1 = arith.constant 0 : i32
    return %arg0, %c0_i32, %c0_i32_0 : i32, i32, i32
  }
}

</mosaic_0001>

<bundles_post_ra>
// kernel: tpu_custom_call.1
= control target key start
LH: loop header
LB: loop body
LE: loop exit
PB: predicated region body
PF: predicated region fallthrough
CT: control target
= control target key end

     0   :  { %s524_s12 = smov 0   ;;  %s614_s0 = inlined_call_operand.vmem [shape: f32[2,4,16], index: 0, kind: input, shape index: {}]   ;;  %s615_s1 = inlined_call_operand.vmem [shape: f32[32,12], index: 1, kind: input, shape index: {}]   ;;  %s616_s2 = inlined_call_operand.vmem [shape: f32[32,2], index: 2, kind: input, shape index: {}]   ;;  %s617_s3 = inlined_call_operand.vmem [shape: f32[2,32,16], index: 3, kind: output, shape index: {}]  }
   0x1 LB: > { %s441_s13 = sadd.s32 4294967295, %s496_s12   ;;  %p445_p0 = scmp.ge.s32.totalorder %s496_s12, 1  ;;  %s496_s12 = sphi %s524_s12, %s13_s12  }
   0x2   : > { %p136_p1 = scmp.lt.s32.totalorder %s496_s12, 3 }
   0x4   : > { %p137_p2 = pnand %p445_p0, %p136_p1 }
   0x5   : > { %p159_p3 = scmp.lt.s32.totalorder (!%p137_p2), %s441_s13, 1  ;;  %s498_s26 = smov (!%p137_p2), 1  }
   0x6   : > { %140 = sbr.rel (%p137_p2) target bundleno = 540 (0x21c), region = 32  ;;  %s501_s29 = smov (!%p137_p2), 126  }
   0x7   : > { %s502_s7 = smov (!%p137_p2), 127  }
   0xb   : > { %v181_v0 = vld [vmem:[%s615_s1 + $0x10] sm:$0xff]  ;;  %vm187_vm0 = vcmask 97280   ;;  %v179_v1 = vld [vmem:[%s615_s1] sm:$0xff]  ;;  %v182_v4 = vld [vmem:[%s615_s1 + $0x18] sm:$0xff]  ;;  %s619_s13 = smov (!%p159_p3, %s441_s13), 1  ;;  %vm168_vm1 = vcmask 3072  }
   0xc   : > { %v194_v2 = vsel %vm187_vm0, %v181_v0, 0.0  ;;  %v188_v3 = vsel %vm187_vm0, %v179_v1, 0.0  ;;  %v180_v5 = vld [vmem:[%s615_s1 + $0x8] sm:$0xff]  ;;  %v197_v6 = vsel %vm187_vm0, %v182_v4, 0.0  ;;  %s446_s22 = sshll.u32 %s619_s13, 2  ;;  %v499_v29 = vmov 0.0  }
   0xd   : > { %195 = vadd.xlane.f32.xlu0 %v194_v2  ;;  %189 = vadd.xlane.f32.xlu1 %v188_v3  ;;  %v191_v7 = vsel %vm187_vm0, %v180_v5, 0.0  ;;  %s162_s25 = scalar_lea.vmem %s614_s0, %s446_s22  ;;  %169 = vst.msk [vmem:[#allocation2] sm:$0xf] %vm168_vm1, %v499_v29  ;;  %vm170_vm2 = vcmask 142472   ;;  %v500_v30 = vmov 0   ;;  %vm177_vm3 = vcmask 134152  }
   0xe   : > { %v172_v28 = vld [vmem:[%s162_s25] sm:$0xf]  ;;  %171 = vst.msk [vmem:[#allocation2] sm:$0xf] %vm170_vm2, %v499_v29  ;;  %477 = vset.pattern.permute.xlu1 %v500_v30  ;;  %478 = vset.pattern.permute.xlu2 %v500_v30  ;;  %v185_v59 = vld [vmem:[%s616_s2 + $0x10] sm:$0xff]  ;;  %vm312_vm1 = vcmask 1043456  }
   0xf   : > { %s456_s10 = sshll.u32 %s619_s13, 5  ;;  %vm381_vm2 = vcmask 130048  }
  0x10   : > { %s167_s15 = scalar_lea.vmem %s617_s3, %s456_s10 }
  0x15   : > { %198 = vadd.xlane.f32.xlu0 %v197_v6  ;;  %192 = vadd.xlane.f32.xlu1 %v191_v7 }
  0x80   : > { %v196_v8 = vpop.xlane.xlu0 %195  ;;  %v190_v9 = vpop.xlane.xlu1 %189 }
  0x81   : > { %v202_v10 = vmul.f32 0.083333336, %v196_v8  ;;  %v200_v11 = vmul.f32 0.083333336, %v190_v9  ;;  %v186_v9 = vld [vmem:[%s616_s2 + $0x18] sm:$0xff] }
  0x83   : > { %v548_v12 = vsub.f32 %v181_v0, %v202_v10  ;;  %v550_v13 = vsub.f32 %v179_v1, %v200_v11 }
  0x85   : > { %v210_v14 = vmul.f32 %v548_v12, %v548_v12  ;;  %v208_v15 = vmul.f32 %v550_v13, %v550_v13 }
  0x87   : > { %v218_v16 = vsel %vm187_vm0, %v210_v14, 0.0  ;;  %v212_v17 = vsel %vm187_vm0, %v208_v15, 0.0  ;;  %v184_v14 = vld [vmem:[%s616_s2 + $0x8] sm:$0xff] }
  0x88   : > { %219 = vadd.xlane.f32.xlu2 %v218_v16  ;;  %v199_v18 = vpop.xlane.xlu0 %198  ;;  %213 = vadd.xlane.f32.xlu0 %v212_v17  ;;  %v193_v19 = vpop.xlane.xlu1 %192 }
  0x89   : > { %v203_v20 = vmul.f32 0.083333336, %v199_v18  ;;  %v201_v21 = vmul.f32 0.083333336, %v193_v19 }
  0x8b   : > { %v558_v22 = vsub.f32 %v182_v4, %v203_v20  ;;  %v560_v23 = vsub.f32 %v180_v5, %v201_v21  ;;  %v183_v21 = vld [vmem:[%s616_s2] sm:$0xff] }
  0x8d   : > { %v211_v24 = vmul.f32 %v558_v22, %v558_v22  ;;  %v209_v25 = vmul.f32 %v560_v23, %v560_v23 }
  0x8f   : > { %v221_v26 = vsel %vm187_vm0, %v211_v24, 0.0  ;;  %v215_v27 = vsel %vm187_vm0, %v209_v25, 0.0 }
  0x90   : > { %222 = vadd.xlane.f32.xlu2 %v221_v26  ;;  %216 = vadd.xlane.f32.xlu1 %v215_v27  ;;  %v503_v26 = vmov 1  }
  0x91   : > { %479 = vset.pattern.permute.xlu0 %v503_v26 }
  0xa8   : > { %174 = vrot.lane.b32.xlu2 %v172_v28, %s498_s26 }
  0xfb   : > { %v220_v31 = vpop.xlane.xlu2 %219  ;;  %v214_v32 = vpop.xlane.xlu0 %213 }
  0xfc   : > { %v226_v33 = vmul.f32 0.09090909, %v220_v31  ;;  %v224_v34 = vmul.f32 0.09090909, %v214_v32 }
  0xfe   : > { %v230_v35 = vmul.f32 384.0, %v226_v33  ;;  %v228_v36 = vmul.f32 384.0, %v224_v34 }
 0x100   : > { %v234_v37 = vmax.f32 %v230_v35, 0.0001  ;;  %v578_v38 = vmax.f32 %v228_v36, 0.0001 }
 0x102   : > { %482 = vrsqrt.f32 %v234_v37  ;;  %vm262_vm5 = vweird.f32 %v234_v37  ;;  %vm242_vm14 = vweird.f32 %v578_v38 }
 0x103   : > { %v223_v39 = vpop.xlane.xlu2 %222  ;;  %v217_v40 = vpop.xlane.xlu1 %216  ;;  %484 = vrsqrt.f32 %v578_v38 }
 0x104   : > { %v227_v41 = vmul.f32 0.09090909, %v223_v39  ;;  %v225_v42 = vmul.f32 0.09090909, %v217_v40 }
 0x106   : > { %v231_v43 = vmul.f32 384.0, %v227_v41  ;;  %v229_v44 = vmul.f32 384.0, %v225_v42 }
 0x108   : > { %v483_v45 = vpop.eup %482  ;;  %v235_v46 = vmax.f32 %v231_v43, 0.0001  ;;  %v233_v47 = vmax.f32 %v229_v44, 0.0001 }
 0x109   : > { %v257_v48 = vmul.f32 %v483_v45, %v234_v37  ;;  %v485_v49 = vpop.eup %484  ;;  %vm263_vm4 = vweird.f32 %v483_v45 }
 0x10a   : > { %486 = vrsqrt.f32 %v235_v46  ;;  %v237_v53 = vmul.f32 %v485_v49, %v578_v38  ;;  %vm264_vm6 = vmor %vm262_vm5, %vm263_vm4  ;;  %vm272_vm9 = vweird.f32 %v235_v46  ;;  %vm252_vm11 = vweird.f32 %v233_v47 }
 0x10b   : > { %v258_v50 = vmul.f32 %v483_v45, %v257_v48  ;;  %488 = vrsqrt.f32 %v233_v47  ;;  %v175_v51 = vpop.permute.xlu2 %174  ;;  %vm243_vm13 = vweird.f32 %v485_v49 }
 0x10c   : > { %178 = vst.msk [vmem:[#allocation2] sm:$0xf] %vm177_vm3, %v175_v51  ;;  %v238_v57 = vmul.f32 %v485_v49, %v237_v53  ;;  %vm244_vm15 = vmor %vm242_vm14, %vm243_vm13 }
 0x10d   : > { %v259_v52 = vmul.f32 0.5, %v258_v50 }
 0x10e   : > { %v239_v3 = vmul.f32 0.5, %v238_v57 }
 0x10f   : > { %v260_v54 = vsub.f32 1.5, %v259_v52 }
 0x110   : > { %v487_v55 = vpop.eup %486  ;;  %v240_v8 = vsub.f32 1.5, %v239_v3 }
 0x111   : > { %v489_v56 = vpop.eup %488  ;;  %v267_v58 = vmul.f32 %v487_v55, %v235_v46  ;;  %v261_v60 = vmul.f32 %v483_v45, %v260_v54  ;;  %vm273_vm7 = vweird.f32 %v487_v55 }
 0x112   : > { %v247_v61 = vmul.f32 %v489_v56, %v233_v47  ;;  %vm253_vm8 = vweird.f32 %v489_v56  ;;  %vm274_vm10 = vmor %vm272_vm9, %vm273_vm7  ;;  %v241_v20 = vmul.f32 %v485_v49, %v240_v8 }
 0x113   : > { %v268_v62 = vmul.f32 %v487_v55, %v267_v58  ;;  %v304_v63 = vld [vmem:[#allocation2] sm:$0xf]  ;;  %v265_v0 = vsel %vm264_vm6, %v483_v45, %v261_v60  ;;  %vm254_vm12 = vmor %vm252_vm11, %vm253_vm8 }
 0x114   : > { %v248_v1 = vmul.f32 %v489_v56, %v247_v61  ;;  %310 = vrot.lane.b32.xlu0 %v304_v63, %s501_s29  ;;  %v278_v2 = vmul.f32 %v265_v0, %v185_v59  ;;  %v306_v11 = vrot.slane %v304_v63, 4  ;;  %v245_v24 = vsel %vm244_vm15, %v485_v49, %v241_v20 }
 0x115   : > { %v269_v4 = vmul.f32 0.5, %v268_v62  ;;  %v276_v25 = vmul.f32 %v245_v24, %v183_v21 }
 0x116   : > { %v249_v5 = vmul.f32 0.5, %v248_v1  ;;  %292 = vperm.xlu1 %477, %v278_v2  }
 0x117   : > { %v270_v6 = vsub.f32 1.5, %v269_v4 }
 0x118   : > { %v250_v7 = vsub.f32 1.5, %v249_v5 }
 0x119   : > { %v271_v10 = vmul.f32 %v487_v55, %v270_v6 }
 0x11a   : > { %v251_v15 = vmul.f32 %v489_v56, %v250_v7 }
 0x11b   : > { %v275_v16 = vsel %vm274_vm10, %v487_v55, %v271_v10 }
 0x11c   : > { %307 = vrot.lane.b32.xlu0 %v306_v11, %s502_s7  ;;  %v255_v17 = vsel %vm254_vm12, %v489_v56, %v251_v15  ;;  %v279_v18 = vmul.f32 %v275_v16, %v186_v9 }
 0x11d   : > { %v277_v19 = vmul.f32 %v255_v17, %v184_v14 }
 0x11e   : > { %297 = vperm.xlu2 %478, %v279_v18  }
 0x11f   : > { %287 = vperm.xlu1 %477, %v277_v19  }
 0x124   : > { %316 = vperm.xlu0 %479, %v183_v21  }
 0x126   : > { %282 = vperm.xlu2 %478, %v276_v25  }
 0x127   : > { %481 = vset.pattern.permute.xlu1 %v503_v26 }
 0x128   : > { %326 = vperm.xlu1 %481, %v185_v59  }
 0x12e   : > { %480 = vset.pattern.permute.xlu2 %v503_v26 }
 0x12f   : > { %321 = vperm.xlu2 %480, %v184_v14  }
 0x137   : > { %331 = vperm.xlu2 %480, %v186_v9  }
 0x178   : > { %v298_v27 = vpop.permute.xlu2 %297 }
 0x179   : > { %v303_v35 = vmul.f32 %v298_v27, %v558_v22 }
 0x180   : > { %v283_v30 = vpop.permute.xlu2 %282 }
 0x181   : > { %v300_v33 = vmul.f32 %v283_v30, %v550_v13 }
 0x186   : > { %v311_v28 = vpop.permute.xlu0 %310 }
 0x187   : > { %449 = vmatpush.msk.msra.mxu0 %vm312_vm1, %v311_v28  ;;  %457 = vmatpush.msk.msra.mxu1 %vm312_vm1, %v311_v28 }
 0x188   : > { %458 = vmatpush.msk.msra.mxu2 %vm312_vm1, %v311_v28  ;;  %459 = vmatpush.msk.msra.mxu3 %vm312_vm1, %v311_v28  ;;  %v293_v29 = vpop.permute.xlu1 %292 }
 0x189   : > { %v302_v34 = vmul.f32 %v293_v29, %v548_v12  ;;  %v322_v13 = vpop.permute.xlu2 %321 }
 0x18e   : > { %v308_v31 = vpop.permute.xlu0 %307 }
 0x18f   : > { %v313_v32 = vsel %vm312_vm1, %v304_v63, %v308_v31 }
 0x190   : > { %363 = vmatpush.msra.mxu0 %v313_v32  ;;  %460 = vmatpush.msra.mxu1 %v313_v32 }
 0x191   : > { %v288_v36 = vpop.permute.xlu1 %287  ;;  %461 = vmatpush.msra.mxu2 %v313_v32  ;;  %462 = vmatpush.msra.mxu3 %v313_v32  ;;  %v332_v44 = vpop.permute.xlu2 %331 }
 0x192   : > { %v301_v37 = vmul.f32 %v288_v36, %v560_v23  ;;  %450 = vmatmul.msk.f32.vlgmr.msra.gmra.mxu0 %vm187_vm0, %v300_v33  ;;  %452 = vmatmul.msk.f32.vlgmr.msra.gmra.mxu2 %vm187_vm0, %v302_v34 }
 0x193   : > { %453 = vmatmul.msk.f32.vlgmr.msra.gmra.mxu3 %vm187_vm0, %v303_v35 }
 0x194   : > { %451 = vmatmul.msk.f32.vlgmr.msra.gmra.mxu1 %vm187_vm0, %v301_v37 }
 0x196   : > { %v317_v38 = vpop.permute.xlu0 %316 }
 0x19a   : > { %v327_v41 = vpop.permute.xlu1 %326 }
 0x20f   : > { %v365_v12 = vpop.f32.mrf.mxu0 }
 0x210   : > { %v366_v39 = vadd.f32 %v365_v12, %v317_v38 }
 0x211   : > { %v368_v22 = vpop.f32.mrf.mxu1 }
 0x212   : > { %v377_v23 = vmax.f32 %v366_v39, 0.0  ;;  %v369_v40 = vadd.f32 %v368_v22, %v322_v13 }
 0x214   : > { %382 = vst.msk [vmem:[%s167_s15] sm:$0xff] %vm381_vm2, %v377_v23  ;;  %v378_v42 = vmax.f32 %v369_v40, 0.0 }
 0x215   : > { %v371_v43 = vpop.f32.mrf.mxu2 }
 0x216   : > { %383 = vst.msk [vmem:[%s167_s15 + $0x8] sm:$0xff] %vm381_vm2, %v378_v42  ;;  %v372_v45 = vadd.f32 %v371_v43, %v327_v41  ;;  %v374_v46 = vpop.f32.mrf.mxu3 }
 0x217   : > { %v375_v47 = vadd.f32 %v374_v46, %v332_v44 }
 0x218   : > { %v379_v48 = vmax.f32 %v372_v45, 0.0 }
 0x219   : > { %v380_v49 = vmax.f32 %v375_v47, 0.0 }
 0x21a   : > { %384 = vst.msk [vmem:[%s167_s15 + $0x10] sm:$0xff] %vm381_vm2, %v379_v48 }
 0x21b   : > { %385 = vst.msk [vmem:[%s167_s15 + $0x18] sm:$0xff] %vm381_vm2, %v380_v49 }
 0x21c PF: > { %s13_s12 = sadd.s32 1, %s496_s12  }
 0x21d   : > { %p10_p4 = scmp.ge.s32.totalorder %s13_s12, 4  }
 0x21f   :  { %12 = sbr.rel (!%p10_p4) target bundleno = 1 (0x1), region = 62 }

</bundles_post_ra>
